<compile_context>
chip_gen: v6e
topology: v6e:2x2x1
jax: 0.10.0
libtpu: 0.0.40
codegen_flags: <defaults>
</compile_context>

<pallas_src>
import jax
import jax.numpy as jnp
from jax.experimental import pallas as pl
from jax.experimental.pallas import tpu as pltpu

_MIB = 1024 * 1024


# ----------------------------------------------------------------------------
# Hardware-aware tiling plan
# ----------------------------------------------------------------------------
def _vmem_capacity_bytes():
    try:
        return int(getattr(pltpu.get_tpu_info(), "vmem_capacity_bytes", 128 * _MIB))
    except Exception:
        return 128 * _MIB


def _choose_tiling(N, rows_out, W, halo, hidden, vmem_bytes):
    """Pick (B_TILE images per grid step, R output rows per row group)."""
    # ~16 live f32 copies of a (hidden, lanes) tile: 9 folded tap tables +
    # h / acc / rolled temporaries.  Smaller budget on v7x (64 MiB VMEM/TC).
    budget = (6 if vmem_bytes <= 64 * _MIB else 12) * _MIB
    lane_cap = max(128, budget // (hidden * 4 * 16))

    divisors = [d for d in range(1, rows_out + 1) if rows_out % d == 0]
    fitting = [d for d in divisors if (d + halo) * W <= lane_cap]
    R = max(fitting) if fitting else min(divisors)

    # Lane-batch images for small spatial stages (lane-dense stores, wide MXU N).
    B = 1
    for d in range(1, N + 1):
        if N % d == 0 and d * (R + halo) * W <= max(lane_cap, 512):
            B = d
    # Keep >= 2 grid steps when possible so both v7x TensorCores get work.
    while B > 1 and (N // B) * (rows_out // R) < 2:
        B = max(d for d in range(1, B) if N % d == 0)
    return B, R


# ----------------------------------------------------------------------------
# Kernels
# ----------------------------------------------------------------------------
def _make_kernel_s1(W, L, expand, identity):
    """stride=1 block on a (C, L) lane-flat tile with 1-row halo top+bottom."""

    def dw(h, dwtab_ref):
        # 9-tap depthwise: lane-rolls (XLU) + precomputed (weight x col-mask) tables.
        acc = h * dwtab_ref[4]
        for k in range(9):
            if k == 4:
                continue
            off = (k // 3 - 1) * W + (k % 3 - 1)
            acc = acc + pltpu.roll(h, (-off) % L, axis=1) * dwtab_ref[k]
        return acc

    if expand:
        def kernel(x_ref, rm_ref, a1_ref, b1_ref, dwtab_ref, b2_ref,
                   a3_ref, b3_ref, o_ref):
            x = x_ref[0, 0]                                        # (C, L) bf16
            h = jnp.dot(a1_ref[...], x, preferred_element_type=jnp.float32)
            h = jnp.clip(h + b1_ref[...], 0.0, 6.0) * rm_ref[0]    # ReLU6, zero halo
            h2 = jnp.clip(dw(h, dwtab_ref) + b2_ref[...], 0.0, 6.0)
            o = jnp.dot(a3_ref[...], h2.astype(jnp.bfloat16),
                        preferred_element_type=jnp.float32) + b3_ref[...]
            if identity:                                           # static flag
                o = o + x.astype(jnp.float32)
            o_ref[0, 0] = o.astype(o_ref.dtype)
    else:
        def kernel(x_ref, dwtab_ref, b1_ref, a2_ref, b2_ref, o_ref):
            xf = x_ref[0, 0].astype(jnp.float32)                   # (hidden, L)
            h2 = jnp.clip(dw(xf, dwtab_ref) + b1_ref[...], 0.0, 6.0)
            o = jnp.dot(a2_ref[...], h2.astype(jnp.bfloat16),
                        preferred_element_type=jnp.float32) + b2_ref[...]
            if identity:
                o = o + xf
            o_ref[0, 0] = o.astype(o_ref.dtype)

    return kernel


def _make_kernel_s2(W2, expand):
    """stride=2 block, polyphase (even/odd rows & cols) decomposition.

    out[r,c] = sum_k w_k * h[2r+di, 2c+dj]; the four h polyphase planes are
    computed from host-prepared x planes, so subsampling happens *before* the
    projection matmul and output store (1/4 FLOPs / bytes vs. full-res).
    """
    # tap k -> (plane, lane shift); col-0 validity is folded into the tap table.
    TAPS = [("oo", W2 + 1), ("oe", W2), ("oo", W2),
            ("eo", 1),      ("ee", 0),  ("eo", 0),
            ("oo", 1),      ("oe", 0),  ("oo", 0)]

    def dw(planes, dwtab_ref):
        acc = planes["ee"] * dwtab_ref[4]
        for k, (pn, sh) in enumerate(TAPS):
            if k == 4:
                continue
            t = planes[pn] if sh == 0 else pltpu.roll(planes[pn], sh, axis=1)
            acc = acc + t * dwtab_ref[k]
        return acc

    if expand:
        def kernel(xee_ref, xeo_ref, xoe_ref, xoo_ref, rm_ref, a1_ref, b1_ref,
                   dwtab_ref, b2_ref, a3_ref, b3_ref, o_ref):
            def ex(xr):
                return jnp.clip(
                    jnp.dot(a1_ref[...], xr[0, 0],
                            preferred_element_type=jnp.float32) + b1_ref[...],
                    0.0, 6.0)
            rm = rm_ref[0]
            planes = {"ee": ex(xee_ref), "eo": ex(xeo_ref),
                      "oe": ex(xoe_ref) * rm, "oo": ex(xoo_ref) * rm}
            h2 = jnp.clip(dw(planes, dwtab_ref) + b2_ref[...], 0.0, 6.0)
            o = jnp.dot(a3_ref[...], h2.astype(jnp.bfloat16),
                        preferred_element_type=jnp.float32) + b3_ref[...]
            o_ref[0, 0] = o.astype(o_ref.dtype)
    else:
        def kernel(xee_ref, xeo_ref, xoe_ref, xoo_ref, dwtab_ref, b1_ref,
                   a2_ref, b2_ref, o_ref):
            planes = {"ee": xee_ref[0, 0].astype(jnp.float32),
                      "eo": xeo_ref[0, 0].astype(jnp.float32),
                      "oe": xoe_ref[0, 0].astype(jnp.float32),
                      "oo": xoo_ref[0, 0].astype(jnp.float32)}
            h2 = jnp.clip(dw(planes, dwtab_ref) + b1_ref[...], 0.0, 6.0)
            o = jnp.dot(a2_ref[...], h2.astype(jnp.bfloat16),
                        preferred_element_type=jnp.float32) + b2_ref[...]
            o_ref[0, 0] = o.astype(o_ref.dtype)

    return kernel


# ----------------------------------------------------------------------------
# Host-side packing: windows / polyphase planes / folded tap & mask tables
# ----------------------------------------------------------------------------
def _pad_lanes(a, L_pad):
    L = a.shape[-1]
    if L == L_pad:
        return a
    pad = [(0, 0)] * (a.ndim - 1) + [(0, L_pad - L)]
    return jnp.pad(a, pad)


def _prep_x_s1(xb, B, R, L_pad):
    N, C, H, W = xb.shape
    NB, G = N // B, H // R
    xpad = jnp.pad(xb, ((0, 0), (0, 0), (1, 1), (0, 0)))            # 1-row zero halo
    idx = jnp.arange(G)[:, None] * R + jnp.arange(R + 2)[None, :]   # (G, R+2)
    xwin = xpad[:, :, idx, :]                                       # (N,C,G,R+2,W)
    xwin = xwin.reshape(NB, B, C, G, R + 2, W).transpose(0, 3, 2, 1, 4, 5)
    return _pad_lanes(xwin.reshape(NB, G, C, B * (R + 2) * W), L_pad)


def _prep_x_s2(xb, B, R2, L2_pad):
    N, C, H, W = xb.shape
    H2, W2 = H // 2, W // 2
    NB, G2 = N // B, H2 // R2
    idx = jnp.arange(G2)[:, None] * R2 + jnp.arange(R2 + 1)[None, :]
    planes = []
    for r0 in (0, 1):
        for c0 in (0, 1):
            p = xb[:, :, r0::2, c0::2]                              # (N,C,H2,W2)
            p = jnp.pad(p, ((0, 0), (0, 0), (1, 0), (0, 0)))        # top halo row
            pw = p[:, :, idx, :]                                    # (N,C,G2,R2+1,W2)
            pw = pw.reshape(NB, B, C, G2, R2 + 1, W2).transpose(0, 3, 2, 1, 4, 5)
            planes.append(_pad_lanes(
                pw.reshape(NB, G2, C, B * (R2 + 1) * W2), L2_pad))
    return planes                                                    # [ee, eo, oe, oo]


def _dw_table_s1(w_dw_scaled, W, rows_win, B, L_pad):
    L = B * rows_win * W
    col = jnp.arange(L) % W
    tabs = []
    for k in range(9):
        dj = k % 3 - 1
        m = ((col + dj >= 0) & (col + dj < W)).astype(jnp.float32)
        tabs.append(w_dw_scaled[:, k][:, None] * m[None, :])
    return _pad_lanes(jnp.stack(tabs), L_pad)                       # (9, hidden, L_pad)


def _dw_table_s2(w_dw_scaled, W2, rows_win, B, L_pad):
    L = B * rows_win * W2
    col = jnp.arange(L) % W2
    m0 = (col >= 1).astype(jnp.float32)
    ones = jnp.ones((L,), jnp.float32)
    tabs = []
    for k in range(9):
        m = m0 if (k % 3 == 0) else ones                            # dj = -1 taps
        tabs.append(w_dw_scaled[:, k][:, None] * m[None, :])
    return _pad_lanes(jnp.stack(tabs), L_pad)


def _rowmask_s1(G, R, W, B, H, L_pad):
    seg = (R + 2) * W
    q = jnp.arange(B * seg) % seg
    padrow = jnp.arange(G)[:, None] * R + (q // W)[None, :]
    m = ((padrow >= 1) & (padrow <= H)).astype(jnp.float32)
    return _pad_lanes(m, L_pad)[:, None, :]                         # (G, 1, L_pad)


def _rowmask_s2(G2, R2, W2, B, L_pad):
    seg = (R2 + 1) * W2
    q = jnp.arange(B * seg) % seg
    planerow = jnp.arange(G2)[:, None] * R2 - 1 + (q // W2)[None, :]
    m = (planerow >= 0).astype(jnp.float32)
    return _pad_lanes(m, L_pad)[:, None, :]


# ----------------------------------------------------------------------------
# Wrapper
# ----------------------------------------------------------------------------
def inverted_residual(x_nchw, params, *, inp, oup, stride, expand_ratio,
                      out_dtype=jnp.float32):
    assert stride in (1, 2)
    hidden = int(round(inp * expand_ratio))
    expand = expand_ratio != 1
    identity = (stride == 1) and (inp == oup)
    N, C, H, W = x_nchw.shape
    assert C == inp
    if stride == 2:
        assert H % 2 == 0 and W % 2 == 0, "TODO(synk): odd spatial dims at stride 2"

    vmem = _vmem_capacity_bytes()
    xb = x_nchw.astype(jnp.bfloat16)                 # bf16 HBM->VMEM (half the bytes)

    if stride == 1:
        rows_out, Wl, halo = H, W, 2
    else:
        rows_out, Wl, halo = H // 2, W // 2, 1
    B, R = _choose_tiling(N, rows_out, Wl, halo, hidden, vmem)
    NB, G = N // B, rows_out // R
    rows_win = R + halo
    L = B * rows_win * Wl
    L_pad = ((L + 127) // 128) * 128                 # lane-dense stores, aligned rolls

    # ---- fold BN (inference form) + index_mask into the weights (host) ----
    if expand:
        a1 = (params["s1"][:, None] * params["w_pw1"]).astype(jnp.bfloat16)
        b1 = params["b1"][:, None].astype(jnp.float32)
        dw_scaled = params["w_dw"] * (params["s2"] * params["mask"])[:, None]
        b2 = params["b2"][:, None].astype(jnp.float32)
        a3 = (params["s3"][:, None] * params["w_pw2"] * params["mask"][None, :]
              ).astype(jnp.bfloat16)
        b3 = params["b3"][:, None].astype(jnp.float32)
    else:
        dw_scaled = params["w_dw"] * params["s1"][:, None]
        b1 = params["b1"][:, None].astype(jnp.float32)
        a2 = (params["s2"][:, None] * params["w_pw"]).astype(jnp.bfloat16)
        b2 = params["b2"][:, None].astype(jnp.float32)

    # ---- host data prep (windows / planes) + kernel selection ----
    if stride == 1:
        x_in = _prep_x_s1(xb, B, R, L_pad)
        dwtab = _dw_table_s1(dw_scaled, Wl, rows_win, B, L_pad)
        if expand:
            rowmask = _rowmask_s1(G, R, Wl, B, H, L_pad)
            kernel = _make_kernel_s1(Wl, L_pad, True, identity)
            args = [x_in, rowmask, a1, b1, dwtab, b2, a3, b3]
            per_grid = {0: "x", 1: "rowmask"}
        else:
            kernel = _make_kernel_s1(Wl, L_pad, False, identity)
            args = [x_in, dwtab, b1, a2, b2]
            per_grid = {0: "x"}
    else:
        planes = _prep_x_s2(xb, B, R, L_pad)
        dwtab = _dw_table_s2(dw_scaled, Wl, rows_win, B, L_pad)
        if expand:
            rowmask = _rowmask_s2(G, R, Wl, B, L_pad)
            kernel = _make_kernel_s2(Wl, True)
            args = planes + [rowmask, a1, b1, dwtab, b2, a3, b3]
            per_grid = {0: "x", 1: "x", 2: "x", 3: "x", 4: "rowmask"}
        else:
            kernel = _make_kernel_s2(Wl, False)
            args = planes + [dwtab, b1, a2, b2]
            per_grid = {0: "x", 1: "x", 2: "x", 3: "x"}

    in_specs = []
    for i, a in enumerate(args):
        kind = per_grid.get(i)
        if kind == "x":
            in_specs.append(pl.BlockSpec((1, 1, C, L_pad),
                                         lambda nb, g: (nb, g, 0, 0)))
        elif kind == "rowmask":
            in_specs.append(pl.BlockSpec((1, 1, L_pad),
                                         lambda nb, g: (g, 0, 0)))
        else:  # constant parameter block, resident across the whole grid
            in_specs.append(pl.BlockSpec(a.shape,
                                         lambda nb, g, nd=a.ndim: (0,) * nd))
    out_specs = pl.BlockSpec((1, 1, oup, L_pad), lambda nb, g: (nb, g, 0, 0))

    vmem_limit = (48 if vmem <= 64 * _MIB else 96) * _MIB
    flops = 2 * N * rows_out * Wl * hidden * ((inp if expand else 0) + 9 + oup)
    bytes_acc = int(sum(int(a.size) * a.dtype.itemsize for a in args)
                    + NB * G * oup * L_pad * jnp.dtype(out_dtype).itemsize)

    out = pl.pallas_call(
        kernel,
        out_shape=jax.ShapeDtypeStruct((NB, G, oup, L_pad), out_dtype),
        grid_spec=pltpu.PrefetchScalarGridSpec(
            num_scalar_prefetch=0,
            grid=(NB, G),
            in_specs=in_specs,
            out_specs=out_specs,
        ),
        compiler_params=pltpu.CompilerParams(
            dimension_semantics=("parallel", "parallel"),
            vmem_limit_bytes=int(vmem_limit),
        ),
        cost_estimate=pl.CostEstimate(flops=int(flops), transcendentals=0,
                                      bytes_accessed=bytes_acc),
    )(*args)

    # Drop lane padding + halo rows, restore NCHW.
    o = out[..., :L].reshape(NB, G, oup, B, rows_win, Wl)[:, :, :, :, 1:1 + R, :]
    o = o.transpose(0, 3, 2, 1, 4, 5).reshape(N, oup, rows_out, Wl)
    return o


# ----------------------------------------------------------------------------
# Deterministic parameter construction (BN in eval form: scale/shift per channel)
# ----------------------------------------------------------------------------
def _fold_bn(key, c, eps=1e-5):
    k1, k2, k3, k4 = jax.random.split(key, 4)
    gamma = 0.5 + jax.random.uniform(k1, (c,), jnp.float32)
    beta = 0.1 * jax.random.normal(k2, (c,), jnp.float32)
    mean = 0.1 * jax.random.normal(k3, (c,), jnp.float32)
    var = 0.5 + jax.random.uniform(k4, (c,), jnp.float32)
    scale = gamma / jnp.sqrt(var + eps)
    shift = beta - mean * scale
    return scale, shift


def init_params(key, inp, oup, expand_ratio):
    hidden = int(round(inp * expand_ratio))
    ks = jax.random.split(key, 6)
    p = {}
    if expand_ratio == 1:
        p["w_dw"] = 0.2 * jax.random.normal(ks[0], (hidden, 9), jnp.float32)
        p["s1"], p["b1"] = _fold_bn(ks[1], hidden)
        p["w_pw"] = 0.2 * jax.random.normal(ks[2], (oup, hidden), jnp.float32)
        p["s2"], p["b2"] = _fold_bn(ks[3], oup)
    else:
        p["w_pw1"] = 0.2 * jax.random.normal(ks[0], (hidden, inp), jnp.float32)
        p["s1"], p["b1"] = _fold_bn(ks[1], hidden)
        p["mask"] = jnp.ones((hidden,), jnp.float32)    # self.index_mask (all ones)
        p["w_dw"] = 0.2 * jax.random.normal(ks[2], (hidden, 9), jnp.float32)
        p["s2"], p["b2"] = _fold_bn(ks[3], hidden)
        p["w_pw2"] = 0.2 * jax.random.normal(ks[4], (oup, hidden), jnp.float32)
        p["s3"], p["b3"] = _fold_bn(ks[5], oup)
    return p


# ----------------------------------------------------------------------------
# Pure-JAX f32 reference (module semantics, for the correctness check)
# ----------------------------------------------------------------------------
def ref_forward(x, p, *, inp, oup, stride, expand_ratio):
    N, C, H, W = x.shape
    identity = (stride == 1) and (inp == oup)

    def bn(t, s, b):
        return t * s[None, :, None, None] + b[None, :, None, None]

    def relu6(t):
        return jnp.clip(t, 0.0, 6.0)

    def dwconv(t, w):                                   # t:(N,C,H,W), w:(C,9)
        Ho = (H - 1) // stride + 1
        Wo = (W - 1) // stride + 1
        tp = jnp.pad(t, ((0, 0), (0, 0), (1, 1), (1, 1)))
        acc = jnp.zeros((N, t.shape[1], Ho, Wo), jnp.float32)
        for k in range(9):
            di, dj = k // 3, k % 3
            acc = acc + tp[:, :, di:di + (Ho - 1) * stride + 1:stride,
                              dj:dj + (Wo - 1) * stride + 1:stride] \
                        * w[:, k][None, :, None, None]
        return acc

    if expand_ratio == 1:
        h = relu6(bn(dwconv(x, p["w_dw"]), p["s1"], p["b1"]))
        o = bn(jnp.einsum("oc,nchw->nohw", p["w_pw"], h), p["s2"], p["b2"])
    else:
        h = relu6(bn(jnp.einsum("dc,nchw->ndhw", p["w_pw1"], x), p["s1"], p["b1"]))
        h = h * p["mask"][None, :, None, None]
        h = relu6(bn(dwconv(h, p["w_dw"]), p["s2"], p["b2"]))
        h = h * p["mask"][None, :, None, None]
        o = bn(jnp.einsum("od,ndhw->nohw", p["w_pw2"], h), p["s3"], p["b3"])
    return x + o if identity else o


# ----------------------------------------------------------------------------
if __name__ == "__main__":
    key = jax.random.PRNGKey(0)
    kx, kp = jax.random.split(key)
    configs = [
        dict(N=2, inp=8,  oup=8,  H=16, W=16, stride=1, expand_ratio=2),  # identity
        dict(N=2, inp=16, oup=8,  H=16, W=16, stride=1, expand_ratio=1),  # no-expand
        dict(N=2, inp=8,  oup=16, H=16, W=16, stride=2, expand_ratio=2),  # strided expand
        dict(N=2, inp=8,  oup=8,  H=16, W=16, stride=2, expand_ratio=1),  # strided no-expand
    ]
    for i, cfg in enumerate(configs):
        x = jax.random.normal(jax.random.fold_in(kx, i),
                              (cfg["N"], cfg["inp"], cfg["H"], cfg["W"]), jnp.float32)
        p = init_params(jax.random.fold_in(kp, i),
                        cfg["inp"], cfg["oup"], cfg["expand_ratio"])
        out = jax.block_until_ready(
            inverted_residual(x, p, inp=cfg["inp"], oup=cfg["oup"],
                              stride=cfg["stride"], expand_ratio=cfg["expand_ratio"]))
        ref = ref_forward(x, p, inp=cfg["inp"], oup=cfg["oup"],
                          stride=cfg["stride"], expand_ratio=cfg["expand_ratio"])
        assert out.shape == ref.shape, (out.shape, ref.shape)
        # bf16 MXU operands / bf16 x DMA vs. the f32 reference -> relaxed tolerance.
        assert jnp.allclose(out, ref, atol=2.5e-1, rtol=5e-2), \
            (i, float(jnp.max(jnp.abs(out - ref))))
    print("KERNEL_OK")
</pallas_src>

<mosaic_0001>
module attributes {stable_mosaic.version = 11 : i64} {
  func.func @kernel(%arg0: i32, %arg1: i32, %arg2: memref<1x1x8x384xbf16, #tpu.memory_space<vmem>>, %arg3: memref<1x1x384xf32, #tpu.memory_space<vmem>>, %arg4: memref<16x8xbf16, #tpu.memory_space<vmem>>, %arg5: memref<16x1xf32, #tpu.memory_space<vmem>>, %arg6: memref<9x16x384xf32, #tpu.memory_space<vmem>>, %arg7: memref<16x1xf32, #tpu.memory_space<vmem>>, %arg8: memref<8x16xbf16, #tpu.memory_space<vmem>>, %arg9: memref<8x1xf32, #tpu.memory_space<vmem>>, %arg10: memref<1x1x8x384xf32, #tpu.memory_space<vmem>>) attributes {dimension_semantics = [#tpu.dimension_semantics<parallel>, #tpu.dimension_semantics<parallel>], iteration_bounds = array<i64: 2, 1>, scalar_prefetch = 0 : i64, scratch_operands = 0 : i64, tpu.core_type = #tpu.core_type<tc>, window_params = [{transform_indices = @transform_0, window_bounds = array<i64: 1, 1, 8, 384>}, {transform_indices = @transform_1, window_bounds = array<i64: 1, 1, 384>}, {pipeline_mode = #tpu.pipeline_mode<synchronous>, transform_indices = @transform_2, window_bounds = array<i64: 16, 8>}, {pipeline_mode = #tpu.pipeline_mode<synchronous>, transform_indices = @transform_3, window_bounds = array<i64: 16, 1>}, {pipeline_mode = #tpu.pipeline_mode<synchronous>, transform_indices = @transform_4, window_bounds = array<i64: 9, 16, 384>}, {pipeline_mode = #tpu.pipeline_mode<synchronous>, transform_indices = @transform_5, window_bounds = array<i64: 16, 1>}, {pipeline_mode = #tpu.pipeline_mode<synchronous>, transform_indices = @transform_6, window_bounds = array<i64: 8, 16>}, {pipeline_mode = #tpu.pipeline_mode<synchronous>, transform_indices = @transform_7, window_bounds = array<i64: 8, 1>}, {transform_indices = @transform_8, window_bounds = array<i64: 1, 1, 8, 384>}]} {
    %c0 = arith.constant 0 : index
    %c0_0 = arith.constant 0 : index
    %c0_1 = arith.constant 0 : index
    %c0_2 = arith.constant 0 : index
    %0 = vector.load %arg2[%c0, %c0_0, %c0_1, %c0_2] : memref<1x1x8x384xbf16, #tpu.memory_space<vmem>>, vector<1x1x8x384xbf16>
    %1 = vector.shape_cast %0 : vector<1x1x8x384xbf16> to vector<8x384xbf16>
    %c0_3 = arith.constant 0 : index
    %c0_4 = arith.constant 0 : index
    %2 = vector.load %arg4[%c0_3, %c0_4] : memref<16x8xbf16, #tpu.memory_space<vmem>>, vector<16x8xbf16>
    %cst = arith.constant dense<0.000000e+00> : vector<16x384xf32>
    %3 = tpu.matmul %2, %1, %cst {dimension_numbers = #tpu.dot_dimension_numbers<[1], [0], [0], [1], [0, 0, 1, 1], [], []>} : vector<16x8xbf16>, vector<8x384xbf16>, vector<16x384xf32> -> vector<16x384xf32>
    %c0_5 = arith.constant 0 : index
    %c0_6 = arith.constant 0 : index
    %4 = vector.load %arg5[%c0_5, %c0_6] : memref<16x1xf32, #tpu.memory_space<vmem>>, vector<16x1xf32>
    %5 = vector.broadcast %4 : vector<16x1xf32> to vector<16x384xf32>
    %6 = arith.addf %3, %5 : vector<16x384xf32>
    %cst_7 = arith.constant 0.000000e+00 : f32
    %cst_8 = arith.constant 6.000000e+00 : f32
    %7 = vector.broadcast %cst_7 : f32 to vector<16x384xf32>
    %8 = arith.maximumf %7, %6 : vector<16x384xf32>
    %9 = vector.broadcast %cst_8 : f32 to vector<16x384xf32>
    %10 = arith.minimumf %9, %8 : vector<16x384xf32>
    %c0_9 = arith.constant 0 : index
    %c0_10 = arith.constant 0 : index
    %c0_11 = arith.constant 0 : index
    %11 = vector.load %arg3[%c0_9, %c0_10, %c0_11] : memref<1x1x384xf32, #tpu.memory_space<vmem>>, vector<1x1x384xf32>
    %12 = vector.shape_cast %11 : vector<1x1x384xf32> to vector<1x384xf32>
    %13 = vector.broadcast %12 : vector<1x384xf32> to vector<16x384xf32>
    %14 = arith.mulf %10, %13 : vector<16x384xf32>
    %c4 = arith.constant 4 : index
    %c0_12 = arith.constant 0 : index
    %c0_13 = arith.constant 0 : index
    %15 = vector.load %arg6[%c4, %c0_12, %c0_13] : memref<9x16x384xf32, #tpu.memory_space<vmem>>, vector<1x16x384xf32>
    %16 = vector.shape_cast %15 : vector<1x16x384xf32> to vector<16x384xf32>
    %17 = arith.mulf %14, %16 : vector<16x384xf32>
    %c17_i32 = arith.constant 17 : i32
    %18 = tpu.dynamic_rotate %14 by %c17_i32 dim 1 : vector<16x384xf32>, i32 -> vector<16x384xf32>
    %c0_14 = arith.constant 0 : index
    %c0_15 = arith.constant 0 : index
    %c0_16 = arith.constant 0 : index
    %19 = vector.load %arg6[%c0_14, %c0_15, %c0_16] : memref<9x16x384xf32, #tpu.memory_space<vmem>>, vector<1x16x384xf32>
    %20 = vector.shape_cast %19 : vector<1x16x384xf32> to vector<16x384xf32>
    %21 = arith.mulf %18, %20 : vector<16x384xf32>
    %22 = arith.addf %17, %21 : vector<16x384xf32>
    %c16_i32 = arith.constant 16 : i32
    %23 = tpu.dynamic_rotate %14 by %c16_i32 dim 1 : vector<16x384xf32>, i32 -> vector<16x384xf32>
    %c1 = arith.constant 1 : index
    %c0_17 = arith.constant 0 : index
    %c0_18 = arith.constant 0 : index
    %24 = vector.load %arg6[%c1, %c0_17, %c0_18] : memref<9x16x384xf32, #tpu.memory_space<vmem>>, vector<1x16x384xf32>
    %25 = vector.shape_cast %24 : vector<1x16x384xf32> to vector<16x384xf32>
    %26 = arith.mulf %23, %25 : vector<16x384xf32>
    %27 = arith.addf %22, %26 : vector<16x384xf32>
    %c15_i32 = arith.constant 15 : i32
    %28 = tpu.dynamic_rotate %14 by %c15_i32 dim 1 : vector<16x384xf32>, i32 -> vector<16x384xf32>
    %c2 = arith.constant 2 : index
    %c0_19 = arith.constant 0 : index
    %c0_20 = arith.constant 0 : index
    %29 = vector.load %arg6[%c2, %c0_19, %c0_20] : memref<9x16x384xf32, #tpu.memory_space<vmem>>, vector<1x16x384xf32>
    %30 = vector.shape_cast %29 : vector<1x16x384xf32> to vector<16x384xf32>
    %31 = arith.mulf %28, %30 : vector<16x384xf32>
    %32 = arith.addf %27, %31 : vector<16x384xf32>
    %c1_i32 = arith.constant 1 : i32
    %33 = tpu.dynamic_rotate %14 by %c1_i32 dim 1 : vector<16x384xf32>, i32 -> vector<16x384xf32>
    %c3 = arith.constant 3 : index
    %c0_21 = arith.constant 0 : index
    %c0_22 = arith.constant 0 : index
    %34 = vector.load %arg6[%c3, %c0_21, %c0_22] : memref<9x16x384xf32, #tpu.memory_space<vmem>>, vector<1x16x384xf32>
    %35 = vector.shape_cast %34 : vector<1x16x384xf32> to vector<16x384xf32>
    %36 = arith.mulf %33, %35 : vector<16x384xf32>
    %37 = arith.addf %32, %36 : vector<16x384xf32>
    %c383_i32 = arith.constant 383 : i32
    %38 = tpu.dynamic_rotate %14 by %c383_i32 dim 1 : vector<16x384xf32>, i32 -> vector<16x384xf32>
    %c5 = arith.constant 5 : index
    %c0_23 = arith.constant 0 : index
    %c0_24 = arith.constant 0 : index
    %39 = vector.load %arg6[%c5, %c0_23, %c0_24] : memref<9x16x384xf32, #tpu.memory_space<vmem>>, vector<1x16x384xf32>
    %40 = vector.shape_cast %39 : vector<1x16x384xf32> to vector<16x384xf32>
    %41 = arith.mulf %38, %40 : vector<16x384xf32>
    %42 = arith.addf %37, %41 : vector<16x384xf32>
    %c369_i32 = arith.constant 369 : i32
    %43 = tpu.dynamic_rotate %14 by %c369_i32 dim 1 : vector<16x384xf32>, i32 -> vector<16x384xf32>
    %c6 = arith.constant 6 : index
    %c0_25 = arith.constant 0 : index
    %c0_26 = arith.constant 0 : index
    %44 = vector.load %arg6[%c6, %c0_25, %c0_26] : memref<9x16x384xf32, #tpu.memory_space<vmem>>, vector<1x16x384xf32>
    %45 = vector.shape_cast %44 : vector<1x16x384xf32> to vector<16x384xf32>
    %46 = arith.mulf %43, %45 : vector<16x384xf32>
    %47 = arith.addf %42, %46 : vector<16x384xf32>
    %c368_i32 = arith.constant 368 : i32
    %48 = tpu.dynamic_rotate %14 by %c368_i32 dim 1 : vector<16x384xf32>, i32 -> vector<16x384xf32>
    %c7 = arith.constant 7 : index
    %c0_27 = arith.constant 0 : index
    %c0_28 = arith.constant 0 : index
    %49 = vector.load %arg6[%c7, %c0_27, %c0_28] : memref<9x16x384xf32, #tpu.memory_space<vmem>>, vector<1x16x384xf32>
    %50 = vector.shape_cast %49 : vector<1x16x384xf32> to vector<16x384xf32>
    %51 = arith.mulf %48, %50 : vector<16x384xf32>
    %52 = arith.addf %47, %51 : vector<16x384xf32>
    %c367_i32 = arith.constant 367 : i32
    %53 = tpu.dynamic_rotate %14 by %c367_i32 dim 1 : vector<16x384xf32>, i32 -> vector<16x384xf32>
    %c8 = arith.constant 8 : index
    %c0_29 = arith.constant 0 : index
    %c0_30 = arith.constant 0 : index
    %54 = vector.load %arg6[%c8, %c0_29, %c0_30] : memref<9x16x384xf32, #tpu.memory_space<vmem>>, vector<1x16x384xf32>
    %55 = vector.shape_cast %54 : vector<1x16x384xf32> to vector<16x384xf32>
    %56 = arith.mulf %53, %55 : vector<16x384xf32>
    %57 = arith.addf %52, %56 : vector<16x384xf32>
    %c0_31 = arith.constant 0 : index
    %c0_32 = arith.constant 0 : index
    %58 = vector.load %arg7[%c0_31, %c0_32] : memref<16x1xf32, #tpu.memory_space<vmem>>, vector<16x1xf32>
    %59 = vector.broadcast %58 : vector<16x1xf32> to vector<16x384xf32>
    %60 = arith.addf %57, %59 : vector<16x384xf32>
    %cst_33 = arith.constant 0.000000e+00 : f32
    %cst_34 = arith.constant 6.000000e+00 : f32
    %61 = vector.broadcast %cst_33 : f32 to vector<16x384xf32>
    %62 = arith.maximumf %61, %60 : vector<16x384xf32>
    %63 = vector.broadcast %cst_34 : f32 to vector<16x384xf32>
    %64 = arith.minimumf %63, %62 : vector<16x384xf32>
    %c0_35 = arith.constant 0 : index
    %c0_36 = arith.constant 0 : index
    %65 = vector.load %arg8[%c0_35, %c0_36] : memref<8x16xbf16, #tpu.memory_space<vmem>>, vector<8x16xbf16>
    %66 = arith.truncf %64 : vector<16x384xf32> to vector<16x384xbf16>
    %cst_37 = arith.constant dense<0.000000e+00> : vector<8x384xf32>
    %67 = tpu.matmul %65, %66, %cst_37 {dimension_numbers = #tpu.dot_dimension_numbers<[1], [0], [0], [1], [0, 0, 1, 1], [], []>} : vector<8x16xbf16>, vector<16x384xbf16>, vector<8x384xf32> -> vector<8x384xf32>
    %c0_38 = arith.constant 0 : index
    %c0_39 = arith.constant 0 : index
    %68 = vector.load %arg9[%c0_38, %c0_39] : memref<8x1xf32, #tpu.memory_space<vmem>>, vector<8x1xf32>
    %69 = vector.broadcast %68 : vector<8x1xf32> to vector<8x384xf32>
    %70 = arith.addf %67, %69 : vector<8x384xf32>
    %71 = arith.extf %1 : vector<8x384xbf16> to vector<8x384xf32>
    %72 = arith.addf %70, %71 : vector<8x384xf32>
    %c0_40 = arith.constant 0 : index
    %c0_41 = arith.constant 0 : index
    %c0_42 = arith.constant 0 : index
    %c0_43 = arith.constant 0 : index
    %73 = vector.load %arg10[%c0_40, %c0_41, %c0_42, %c0_43] : memref<1x1x8x384xf32, #tpu.memory_space<vmem>>, vector<1x1x8x384xf32>
    %74 = vector.shape_cast %73 : vector<1x1x8x384xf32> to vector<8x384xf32>
    %75 = vector.shape_cast %72 : vector<8x384xf32> to vector<1x1x8x384xf32>
    tpu.vector_store %arg10[%c0_40, %c0_41, %c0_42, %c0_43], %75 {strides = array<i32>} : memref<1x1x8x384xf32, #tpu.memory_space<vmem>>, vector<1x1x8x384xf32>,
    return
  }
  func.func @transform_0(%arg0: i32, %arg1: i32) -> (i32, i32, i32, i32) {
    %c0_i32 = arith.constant 0 : i32
    %c0_i32_0 = arith.constant 0 : i32
    %c0_i32_1 = arith.constant 0 : i32
    return %arg0, %arg1, %c0_i32, %c0_i32_0 : i32, i32, i32, i32
  }
  func.func @transform_1(%arg0: i32, %arg1: i32) -> (i32, i32, i32) {
    %c0_i32 = arith.constant 0 : i32
    %c0_i32_0 = arith.constant 0 : i32
    %c0_i32_1 = arith.constant 0 : i32
    return %arg1, %c0_i32, %c0_i32_0 : i32, i32, i32
  }
  func.func @transform_2(%arg0: i32, %arg1: i32) -> (i32, i32) {
    %c0_i32 = arith.constant 0 : i32
    %c0_i32_0 = arith.constant 0 : i32
    %c0_i32_1 = arith.constant 0 : i32
    return %c0_i32, %c0_i32_0 : i32, i32
  }
  func.func @transform_3(%arg0: i32, %arg1: i32) -> (i32, i32) {
    %c0_i32 = arith.constant 0 : i32
    %c0_i32_0 = arith.constant 0 : i32
    %c0_i32_1 = arith.constant 0 : i32
    return %c0_i32, %c0_i32_0 : i32, i32
  }
  func.func @transform_4(%arg0: i32, %arg1: i32) -> (i32, i32, i32) {
    %c0_i32 = arith.constant 0 : i32
    %c0_i32_0 = arith.constant 0 : i32
    %c0_i32_1 = arith.constant 0 : i32
    %c0_i32_2 = arith.constant 0 : i32
    return %c0_i32, %c0_i32_0, %c0_i32_1 : i32, i32, i32
  }
  func.func @transform_5(%arg0: i32, %arg1: i32) -> (i32, i32) {
    %c0_i32 = arith.constant 0 : i32
    %c0_i32_0 = arith.constant 0 : i32
    %c0_i32_1 = arith.constant 0 : i32
    return %c0_i32, %c0_i32_0 : i32, i32
  }
  func.func @transform_6(%arg0: i32, %arg1: i32) -> (i32, i32) {
    %c0_i32 = arith.constant 0 : i32
    %c0_i32_0 = arith.constant 0 : i32
    %c0_i32_1 = arith.constant 0 : i32
    return %c0_i32, %c0_i32_0 : i32, i32
  }
  func.func @transform_7(%arg0: i32, %arg1: i32) -> (i32, i32) {
    %c0_i32 = arith.constant 0 : i32
    %c0_i32_0 = arith.constant 0 : i32
    %c0_i32_1 = arith.constant 0 : i32
    return %c0_i32, %c0_i32_0 : i32, i32
  }
  func.func @transform_8(%arg0: i32, %arg1: i32) -> (i32, i32, i32, i32) {
    %c0_i32 = arith.constant 0 : i32
    %c0_i32_0 = arith.constant 0 : i32
    %c0_i32_1 = arith.constant 0 : i32
    return %arg0, %arg1, %c0_i32, %c0_i32_0 : i32, i32, i32, i32
  }
}

</mosaic_0001>

<bundles_post_ra>
// kernel: tpu_custom_call.1
= control target key start
LH: loop header
LB: loop body
LE: loop exit
PB: predicated region body
PF: predicated region fallthrough
CT: control target
= control target key end

     0   :  { %13 = vsyncpa [#allocation3], 0  ;;  %s1928_s0 = inlined_call_operand.vmem [shape: bf16[2,1,8,384], index: 0, kind: input, shape index: {}]   ;;  %s1929_s1 = inlined_call_operand.vmem [shape: f32[1,1,384], index: 1, kind: input, shape index: {}]   ;;  %s1930_s2 = inlined_call_operand.vmem [shape: bf16[16,8], index: 2, kind: input, shape index: {}]   ;;  %s1931_s3 = inlined_call_operand.vmem [shape: f32[16,1], index: 3, kind: input, shape index: {}]   ;;  %s1932_s4 = inlined_call_operand.hbm [shape: f32[9,16,384], index: 4, kind: input, shape index: {}]   ;;  %s1933_s5 = inlined_call_operand.vmem [shape: f32[16,1], index: 5, kind: input, shape index: {}]   ;;  %s1934_s6 = inlined_call_operand.vmem [shape: bf16[8,16], index: 6, kind: input, shape index: {}]   ;;  %s1935_s7 = inlined_call_operand.vmem [shape: f32[8,1], index: 7, kind: input, shape index: {}]   ;;  %s1936_s8 = inlined_call_operand.hbm [shape: f32[2,1,8,384], index: 8, kind: output, shape index: {}]  }
   0x1   :  { %14 = vsyncpa [#allocation4], 0 }
   0x2   :  { %16 = vsyncpa [#allocation4 + $0x1], 0  ;;  %s1395_s27 = smov 0   ;;  %s1397_s28 = smov 0  }
   0x3   :  { %s1399_s29 = smov 0   ;;  %s1401_s30 = smov 0  }
   0x4   :  { %s1403_s9 = smov 0   ;;  %s1405_s10 = smov 0  }
   0x5 LB: > { %s1102_s11 = sadd.s32 4294967295, %s1333_s10   ;;  %s1103_s12 = sadd.s32 4294967294, %s1333_s10   ;;  %s1333_s10 = sphi %s1405_s10, %s22_s10   ;;  %s1329_s9 = sphi %s1403_s9, %s1945_s9   ;;  %s1325_s30 = sphi %s1401_s30, %s1944_s30   ;;  %s1321_s29 = sphi %s1399_s29, %s1943_s29   ;;  %s1317_s28 = sphi %s1397_s28, %s1942_s28   ;;  %s1313_s27 = sphi %s1395_s27, %s1941_s27  }
   0x6   : > { %s34_s13 = sadd.s32 1, %s1329_s9  ;;  %s223_s14 = sadd.s32 1, %s1321_s29 }
   0x7   : > { %p36_p0 = scmp.ge.s32.totalorder %s34_s13, 2  ;;  %p233_p1 = scmp.ne.s32.totalorder %s1321_s29, %s1317_s28 }
   0x8   : > { %p234_p2 = scmp.eq.s32.totalorder %s1102_s11, 1  ;;  %p239_p3 = scmp.ne.s32.totalorder %s1317_s28, %s1313_s27 }
   0x9   : > { %s1947_s13 = smov (%p36_p0, %s34_s13), 0  ;;  %p240_p5 = scmp.eq.s32.totalorder %s1103_s12, 1 }
   0xa   : > { %p1435_p4 = por %p234_p2, %p233_p1  ;;  %s218_s16 = ssub.s32 %s1329_s9, %s1947_s13 }
   0xb   : > { %p1104_p6 = scmp.ge.s32.totalorder %s1333_s10, 1  ;;  %p221_p7 = scmp.eq.s32.totalorder %s218_s16, 0 }
   0xc   : > { %p1442_p8 = por %p240_p5, %p239_p3  ;;  %p247_p9 = scmp.lt.s32.totalorder %s1333_s10, 3 }
   0xd   : > { %s1448_s18 = scalar_select %p221_p7, %s1321_s29, %s223_s14  }
   0xe   : > { %p1450_p10 = pnand %p1104_p6, %p247_p9  ;;  %p1454_p11 = scmp.eq.s32.totalorder %s1102_s11, 0 }
   0xf   : > { %s1335_s21 = smov [#allocation2]  }
  0x10   : > { %p1148_p12 = pneg %p1450_p10  ;;  %s272_s22 = sshll.u32 %s1335_s21, 4  ;;  %s273_s22 = int_to_ptr.vmem [resolvable:$true] %s272_s22 }
  0x11   : > { %s1238_s23 = scalar_lea.vmem %s273_s22, 6912  ;;  %p1246_p5 = scmp.lt.s32.totalorder %s273_s22, %s273_s22 }
  0x12   : > { %p1149_p13 = pnand %p1454_p11, %p1148_p12  ;;  %p1239_p1 = scmp.ne.s32.totalorder %s273_s22, %s1238_s23 }
  0x13   : > { %p1247_p6 = scmp.lt.s32.totalorder %s1238_s23, %s1238_s23 }
  0x14   : > { %p1229_p0 = pneg %p1149_p13 }
  0x15   : > { %p1248_p7 = por %p1247_p6, %p1246_p5 }
  0x16   : > { %p1241_p2 = pnand %p1239_p1, %p1229_p0 }
  0x18   : > { %p1242_p3 = pneg %p1241_p2 }
  0x1a   : > { %p1249_p9 = pnand %p1248_p7, %p1242_p3 }
  0x1c   : > { %1252 = shalt.err (!%p1249_p9)
}
  0x1d   : > { %s1336_s24 = smov 384   ;;  %s1337_s25 = smov 24  }
  0x1e   : > { %1151 = dma.hbm_to_vmem [thread:$0]  (!%p1149_p13), %s1932_s4, 6912, %s273_s22, [#allocation3], %s1336_s24, %s1336_s24, %s1337_s25  }
  0x1f   : > { %309 = sbr.rel (%p1450_p10) target bundleno = 691 (0x2b3), region = 52 }
  0x24   : > { %1304 = dma.done.wait (%p1454_p11), [#allocation3], 6912  }
  0x25   : > { %1306 = vsyncadd (%p1454_p11), [#allocation3], 4294960384  ;;  %p351_p12 = scmp.lt.s32.totalorder %s1325_s30, 1  ;;  %v1338_v0 = vmov 0.0   ;;  %v1339_v1 = vmov 0   ;;  %vm1340_vm0 = vmmov 0   ;;  %v506_v14 = vlaneseq }
  0x26   : > { %1127 = vmatprep.subr.bf16.mxu1 %v1338_v0  ;;  %440 = vmatprep.mubr.bf16.mxu0 %v1339_v1  ;;  %vm398_vm1 = vcmask 1043456   ;;  %v369_v7 = vld [vmem:[%s1931_s3] sm:$0xff]  ;;  %v846_v8 = vld [vmem:[%s1933_s5 + $0x8] sm:$0xff]  ;;  %vm394_vm2 = vcmask 64512   ;;  %s1341_s20 = smov 17   ;;  %s1342_s22 = smov 16  }
  0x27   : > { %s352_s12 = scalar_select %p351_p12, %s1325_s30, 1  ;;  %1129 = vmatprep.mubr.msk.bf16.mxu1 %vm1340_vm0, %v1338_v0  ;;  %1221 = vset.pattern.permute.xlu0 %v1339_v1  ;;  %v1226_v11 = vld [vmem:[%s1930_s2] sm:$0xff]   ;;  %v370_v12 = vld [vmem:[%s1931_s3 + $0x8] sm:$0xff]  ;;  %v1504_v15 = vshrl.u32 %v506_v14, 7  ;;  %v1623_v58 = vand.u32 127, %v506_v14  ;;  %vm885_vm11 = vcmask 130048  }
  0x28   : > { %1222 = vset.pattern.permute.xlu1 %v1339_v1  ;;  %373 = vperm.xlu0 %1221, %v369_v7   ;;  %v845_v13 = vld [vmem:[%s1933_s5] sm:$0xff]  ;;  %s1343_s23 = smov 15   ;;  %s1344_s24 = smov 1   ;;  %v599_v7 = vld [vmem:[#allocation2 + $0x30] sm:$0xff] }
  0x29   : > { %s1140_s14 = smul.u32 12, %s352_s12  ;;  %854 = vperm.xlu1 %1222, %v846_v8   ;;  %v508_v17 = vsub.s32 0, %v1504_v15  ;;  %v516_v18 = vsub.s32 2, %v1504_v15  ;;  %v1511_v20 = vld [vmem:[%s1929_s1] sm:$0x7]  ;;  %s1345_s25 = smov 127  }
  0x2a   : > { %s1346_s26 = smov 113   ;;  %s1347_s11 = smov 112   ;;  %v512_v48 = vsub.s32 1, %v1504_v15  ;;  %v879_v57 = vld [vmem:[%s1935_s7] sm:$0xff]  ;;  %vm554_vm3 = vcmp.lt.s32.totalorder %v1623_v58, 17  ;;  %vm591_vm4 = vcmp.lt.s32.totalorder %v1623_v58, 16 }
  0x2b   : > { %s359_s21 = scalar_lea.vmem %s1928_s0, %s1140_s14  ;;  %v509_v28 = vrot.slane %v1511_v20, %v508_v17  ;;  %v517_v30 = vrot.slane %v1511_v20, %v516_v18  ;;  %s1348_s12 = smov 111   ;;  %v564_v15 = vld [vmem:[#allocation2 + $0x18] sm:$0xff]  ;;  %vm629_vm5 = vcmp.lt.s32.totalorder %v1623_v58, 15  ;;  %vm667_vm6 = vcmp.lt.s32.totalorder %v1623_v58, 1 }
  0x2c   : > { %v1477_v2 = vld [vmem:[%s359_s21] sm:$0xff]  ;;  %v1479_v3 = vld [vmem:[%s359_s21 + $0x8] sm:$0xf]  ;;  %378 = vperm.xlu0 %1221, %v370_v12   ;;  %v513_v51 = vrot.slane %v1511_v20, %v512_v48  ;;  %vm705_vm7 = vcmp.lt.s32.totalorder %v1623_v58, 127  ;;  %vm743_vm8 = vcmp.lt.s32.totalorder %v1623_v58, 113  ;;  %vm781_vm9 = vcmp.lt.s32.totalorder %v1623_v58, 112 }
  0x2d   : > { %v1113_v4 = vcombine.high %v1477_v2, %v1477_v2  ;;  %v1112_v5 = vcombine.low %v1477_v2, %v1477_v2  ;;  %v1114_v6 = vcombine.low %v1479_v3, %v1479_v3  ;;  %vm819_vm10 = vcmp.lt.s32.totalorder %v1623_v58, 111  ;;  %s1349_s16 = smov [#allocation5]  }
  0x2e   : > { %s1257_s19 = sshll.u32 %s1349_s16, 4  ;;  %s1258_s19 = int_to_ptr.vmem [resolvable:$false] %s1257_s19 }
  0x2f   : > { %1115 = vmatprep.subr.msk.bf16.mxu0 %vm398_vm1, %v1113_v4  ;;  %v400_v9 = vsel %vm398_vm1, %v1112_v5, 0  ;;  %v406_v10 = vsel %vm398_vm1, %v1114_v6, 0  ;;  %v528_v5 = vld [vmem:[#allocation2 + $0xc0] sm:$0xff]  ;;  %s1259_s21 = scalar_lea.vmem %s1258_s19, 768 }
  0x30   : > { %423 = vmatpush1.bf16.msra.mxu0 %v400_v9  ;;  %1128 = vmatpush3.bf16.msra.mxu1 %v406_v10 }
  0x31   : > { %1133 = vmatprep.subr.bf16.mxu1 %v1338_v0  ;;  %849 = vperm.xlu0 %1221, %v845_v13  }
  0x33   : > { %1116 = vmatmul.mubr.msk.bf16.vlgmr.msra.gmra.mxu0 %vm394_vm2, %v1226_v11  ;;  %1130 = vmatmul.mubr.msk.bf16.vlgmr.msra.gmra.mxu1 %vm394_vm2, %v1226_v11 }
  0x34   : > { %921 = vmatprep.mubr.bf16.mxu0 %v1339_v1  ;;  %1135 = vmatprep.mubr.msk.bf16.mxu1 %vm1340_vm0, %v1338_v0  ;;  %v561_v0 = vld [vmem:[#allocation2] sm:$0xff] }
  0xa3   : > { %v374_v16 = vpop.permute.xlu0 %373 }
  0xa4   : > { %v1625_v59 = vpop.permute.xlu1 %854 }
  0xa7   : > { %v379_v26 = vpop.permute.xlu0 %378 }
  0xac   : > { %v1627_v60 = vpop.permute.xlu0 %849 }
  0xf3   : > { %v442_v19 = vpop.f32.mrf.mxu0  ;;  %v485_v21 = vpop.f32.mrf.mxu1 }
  0xf4   : > { %v443_v22 = vadd.f32 %v442_v19, %v374_v16  ;;  %v486_v23 = vadd.f32 %v485_v21, %v374_v16  ;;  %v531_v19 = vld [vmem:[#allocation2 + $0xd8] sm:$0xff]  ;;  %v637_v21 = vld [vmem:[#allocation2 + $0x60] sm:$0xff] }
  0xf5   : > { %v444_v24 = vpop.f32.mrf.mxu0  ;;  %v1131_v25 = vpop.f32.mrf.mxu1 }
  0xf6   : > { %v492_v27 = vmax.f32 %v443_v22, 0.0  ;;  %v494_v29 = vmax.f32 %v486_v23, 0.0  ;;  %v445_v46 = vadd.f32 %v444_v24, %v374_v16  ;;  %v602_v22 = vld [vmem:[#allocation2 + $0x48] sm:$0xff] }
  0xf7   : > { %v446_v31 = vpop.f32.mrf.mxu0  ;;  %v488_v32 = vpop.f32.mrf.mxu1 }
  0xf8   : > { %v498_v33 = vmin.f32 %v492_v27, 6.0  ;;  %v500_v34 = vmin.f32 %v494_v29, 6.0  ;;  %v447_v35 = vadd.f32 %v446_v31, %v379_v26  ;;  %v489_v36 = vadd.f32 %v488_v32, %v379_v26 }
  0xf9   : > { %v1132_v37 = vpop.f32.mrf.mxu1  ;;  %v493_v47 = vmax.f32 %v445_v46, 0.0  ;;  %v448_v49 = vpop.f32.mrf.mxu0 }
  0xfa   : > { %v1515_v38 = vmul.f32 %v509_v28, %v498_v33  ;;  %v1517_v39 = vmul.f32 %v517_v30, %v500_v34  ;;  %v495_v40 = vmax.f32 %v447_v35, 0.0  ;;  %v497_v41 = vmax.f32 %v489_v36, 0.0  ;;  %v675_v35 = vld [vmem:[#allocation2 + $0x90] sm:$0xff]  ;;  %v640_v36 = vld [vmem:[#allocation2 + $0x78] sm:$0xff] }
  0xfb   : > { %v499_v50 = vmin.f32 %v493_v47, 6.0  ;;  %v449_v52 = vadd.f32 %v448_v49, %v379_v26  ;;  %v678_v49 = vld [vmem:[#allocation2 + $0xa8] sm:$0xff] }
  0xfc   : > { %v501_v42 = vmin.f32 %v495_v40, 6.0  ;;  %548 = vrot.lane.b32.xlu0 %v1517_v39, %s1341_s20  ;;  %540 = vrot.lane.b32.xlu1 %v1515_v38, %s1341_s20  ;;  %v503_v44 = vmin.f32 %v497_v41, 6.0  ;;  %v534_v8 = vmul.f32 %v528_v5, %v1515_v38 }
  0xfd   : > { %v1580_v53 = vmul.f32 %v513_v51, %v499_v50  ;;  %v496_v54 = vmax.f32 %v449_v52, 0.0 }
  0xfe   : > { %v1523_v43 = vmul.f32 %v509_v28, %v501_v42  ;;  %v1529_v45 = vmul.f32 %v517_v30, %v503_v44 }
  0xff   : > { %v502_v55 = vmin.f32 %v496_v54, 6.0 }
 0x100   : > { %579 = vrot.lane.b32.xlu0 %v1515_v38, %s1342_s22  ;;  %542 = vrot.lane.b32.xlu1 %v1523_v43, %s1341_s20  ;;  %v537_v23 = vmul.f32 %v531_v19, %v1523_v43 }
 0x101   : > { %v1589_v56 = vmul.f32 %v513_v51, %v502_v55 }
 0x104   : > { %587 = vrot.lane.b32.xlu0 %v1517_v39, %s1342_s22  ;;  %550 = vrot.lane.b32.xlu1 %v1529_v45, %s1341_s20 }
 0x108   : > { %617 = vrot.lane.b32.xlu0 %v1515_v38, %s1343_s23  ;;  %581 = vrot.lane.b32.xlu1 %v1523_v43, %s1342_s22 }
 0x10c   : > { %625 = vrot.lane.b32.xlu0 %v1517_v39, %s1343_s23  ;;  %589 = vrot.lane.b32.xlu1 %v1529_v45, %s1342_s22 }
 0x110   : > { %655 = vrot.lane.b32.xlu0 %v1515_v38, %s1344_s24  ;;  %619 = vrot.lane.b32.xlu1 %v1523_v43, %s1343_s23 }
 0x114   : > { %663 = vrot.lane.b32.xlu0 %v1517_v39, %s1344_s24  ;;  %627 = vrot.lane.b32.xlu1 %v1529_v45, %s1343_s23 }
 0x118   : > { %701 = vrot.lane.b32.xlu0 %v1517_v39, %s1345_s25  ;;  %657 = vrot.lane.b32.xlu1 %v1523_v43, %s1344_s24 }
 0x11c   : > { %693 = vrot.lane.b32.xlu0 %v1515_v38, %s1345_s25  ;;  %665 = vrot.lane.b32.xlu1 %v1529_v45, %s1344_s24 }
 0x120   : > { %739 = vrot.lane.b32.xlu0 %v1517_v39, %s1346_s26  ;;  %703 = vrot.lane.b32.xlu1 %v1529_v45, %s1345_s25 }
 0x124   : > { %731 = vrot.lane.b32.xlu0 %v1515_v38, %s1346_s26  ;;  %695 = vrot.lane.b32.xlu1 %v1523_v43, %s1345_s25 }
 0x128   : > { %777 = vrot.lane.b32.xlu0 %v1517_v39, %s1347_s11  ;;  %741 = vrot.lane.b32.xlu1 %v1529_v45, %s1346_s26 }
 0x12c   : > { %769 = vrot.lane.b32.xlu0 %v1515_v38, %s1347_s11  ;;  %733 = vrot.lane.b32.xlu1 %v1523_v43, %s1346_s26 }
 0x130   : > { %815 = vrot.lane.b32.xlu0 %v1517_v39, %s1348_s12  ;;  %779 = vrot.lane.b32.xlu1 %v1529_v45, %s1347_s11 }
 0x134   : > { %544 = vrot.lane.b32.xlu0 %v1580_v53, %s1341_s20  ;;  %771 = vrot.lane.b32.xlu1 %v1523_v43, %s1347_s11 }
 0x138   : > { %583 = vrot.lane.b32.xlu0 %v1580_v53, %s1342_s22  ;;  %817 = vrot.lane.b32.xlu1 %v1529_v45, %s1348_s12 }
 0x13c   : > { %621 = vrot.lane.b32.xlu0 %v1580_v53, %s1343_s23  ;;  %546 = vrot.lane.b32.xlu1 %v1589_v56, %s1341_s20  ;;  %s348_s20 = sand.u32 1, %s1317_s28  }
 0x140   : > { %659 = vrot.lane.b32.xlu0 %v1580_v53, %s1344_s24  ;;  %585 = vrot.lane.b32.xlu1 %v1589_v56, %s1342_s22  ;;  %s1139_s22 = smul.u32 24, %s348_s20 }
 0x144   : > { %697 = vrot.lane.b32.xlu0 %v1580_v53, %s1345_s25  ;;  %623 = vrot.lane.b32.xlu1 %v1589_v56, %s1343_s23  ;;  %s1141_s23 = smul.u32 384, %s1325_s30  ;;  %s980_s30 = scalar_lea.sflag [#allocation4], %s348_s20 }
 0x148   : > { %735 = vrot.lane.b32.xlu0 %v1580_v53, %s1346_s26  ;;  %661 = vrot.lane.b32.xlu1 %v1589_v56, %s1344_s24  ;;  %s350_s24 = scalar_lea.vmem [#allocation5], %s1139_s22 }
 0x14c   : > { %773 = vrot.lane.b32.xlu0 %v1580_v53, %s1347_s11  ;;  %699 = vrot.lane.b32.xlu1 %v1589_v56, %s1345_s25  ;;  %s996_s25 = sshll.u32 %s350_s24, 4  ;;  %s1884_s25 = int_to_ptr.vmem [resolvable:$true] %s996_s25 }
 0x14d   : > { %s1253_s14 = scalar_lea.vmem %s1884_s25, 384  ;;  %p1260_p0 = scmp.lt.s32.totalorder %s1884_s25, %s1258_s19 }
 0x14e   : > { %p1254_p10 = scmp.ne.s32.totalorder %s1884_s25, %s1253_s14  ;;  %p1261_p1 = scmp.lt.s32.totalorder %s1259_s21, %s1253_s14 }
 0x150   : > { %811 = vrot.lane.b32.xlu0 %v1580_v53, %s1348_s12  ;;  %737 = vrot.lane.b32.xlu1 %v1589_v56, %s1346_s26  ;;  %p1255_p11 = pnand %p1254_p10, %p1435_p4  ;;  %p1262_p2 = por %p1261_p1, %p1260_p0 }
 0x152   : > { %p1256_p13 = pneg %p1255_p11 }
 0x154   : > { %807 = vrot.lane.b32.xlu0 %v1515_v38, %s1348_s12  ;;  %775 = vrot.lane.b32.xlu1 %v1589_v56, %s1347_s11  ;;  %p1263_p3 = pnand %p1262_p2, %p1256_p13 }
 0x158   : > { %882 = vperm.xlu0 %1221, %v879_v57   ;;  %813 = vrot.lane.b32.xlu1 %v1589_v56, %s1348_s12 }
 0x15c   : > { %809 = vrot.lane.b32.xlu1 %v1523_v43, %s1348_s12  ;;  %s1882_s12 = scalar_lea.hbm %s1936_s8, %s1141_s23 }
 0x16e   : > { %v1630_v61 = vpop.permute.xlu0 %548  ;;  %v1632_v62 = vpop.permute.xlu1 %540 }
 0x16f   : > { %v559_v63 = vsel %vm554_vm3, %v1630_v61, %v1632_v62 }
 0x170   : > { %v567_v6 = vmul.f32 %v561_v0, %v559_v63 }
 0x172   : > { %v1638_v1 = vpop.permute.xlu0 %579  ;;  %v1640_v4 = vpop.permute.xlu1 %542  ;;  %v573_v13 = vadd.f32 %v567_v6, %v534_v8 }
 0x176   : > { %v1644_v9 = vpop.permute.xlu0 %587  ;;  %v1646_v10 = vpop.permute.xlu1 %550 }
 0x177   : > { %v596_v11 = vsel %vm591_vm4, %v1644_v9, %v1638_v1  ;;  %v560_v12 = vsel %vm554_vm3, %v1646_v10, %v1640_v4 }
 0x178   : > { %v605_v14 = vmul.f32 %v599_v7, %v596_v11  ;;  %v570_v20 = vmul.f32 %v564_v15, %v560_v12  ;;  %v562_v15 = vld [vmem:[#allocation2 + $0x8] sm:$0xff] }
 0x17a   : > { %v611_v16 = vadd.f32 %v605_v14, %v573_v13  ;;  %v1656_v17 = vpop.permute.xlu0 %617  ;;  %v1658_v18 = vpop.permute.xlu1 %581  ;;  %v576_v28 = vadd.f32 %v570_v20, %v537_v23  ;;  %v530_v14 = vld [vmem:[#allocation2 + $0xd0] sm:$0xff] }
 0x17e   : > { %v1662_v24 = vpop.permute.xlu0 %625  ;;  %v1664_v25 = vpop.permute.xlu1 %589 }
 0x17f   : > { %v634_v26 = vsel %vm629_vm5, %v1662_v24, %v1656_v17  ;;  %v597_v27 = vsel %vm591_vm4, %v1664_v25, %v1658_v18 }
 0x180   : > { %v643_v29 = vmul.f32 %v637_v21, %v634_v26  ;;  %v608_v30 = vmul.f32 %v602_v22, %v597_v27  ;;  %v529_v21 = vld [vmem:[#allocation2 + $0xc8] sm:$0xff]  ;;  %v536_v26 = vmul.f32 %v530_v14, %v1517_v39 }
 0x181   : > { %v566_v14 = vld [vmem:[#allocation2 + $0x28] sm:$0xff] }
 0x182   : > { %v649_v31 = vadd.f32 %v643_v29, %v611_v16  ;;  %v614_v32 = vadd.f32 %v608_v30, %v576_v28  ;;  %v1674_v33 = vpop.permute.xlu0 %655  ;;  %v1676_v34 = vpop.permute.xlu1 %619  ;;  %v563_v16 = vld [vmem:[#allocation2 + $0x10] sm:$0xff]  ;;  %v600_v29 = vld [vmem:[#allocation2 + $0x38] sm:$0xff]  ;;  %v601_v30 = vld [vmem:[#allocation2 + $0x40] sm:$0xff] }
 0x186   : > { %v1679_v37 = vpop.permute.xlu0 %663  ;;  %v1681_v38 = vpop.permute.xlu1 %627 }
 0x187   : > { %v672_v40 = vsel %vm667_vm6, %v1679_v37, %v1674_v33  ;;  %v635_v41 = vsel %vm629_vm5, %v1681_v38, %v1676_v34 }
 0x188   : > { %v681_v42 = vmul.f32 %v675_v35, %v672_v40  ;;  %v646_v43 = vmul.f32 %v640_v36, %v635_v41  ;;  %v532_v40 = vld [vmem:[#allocation2 + $0xe0] sm:$0xff]  ;;  %v533_v41 = vld [vmem:[#allocation2 + $0xe8] sm:$0xff] }
 0x18a   : > { %v1691_v44 = vadd.f32 %v681_v42, %v649_v31  ;;  %v652_v46 = vadd.f32 %v646_v43, %v614_v32  ;;  %v1693_v47 = vpop.permute.xlu0 %701  ;;  %v1695_v48 = vpop.permute.xlu1 %657  ;;  %v535_v31 = vmul.f32 %v529_v21, %v1580_v53  ;;  %v538_v53 = vmul.f32 %v532_v40, %v1589_v56 }
 0x18e   : > { %v1697_v50 = vpop.permute.xlu0 %693  ;;  %v1699_v51 = vpop.permute.xlu1 %665 }
 0x18f   : > { %v673_v52 = vsel %vm667_vm6, %v1699_v51, %v1695_v48 }
 0x190   : > { %v684_v54 = vmul.f32 %v678_v49, %v673_v52  ;;  %v639_v49 = vld [vmem:[#allocation2 + $0x70] sm:$0xff]  ;;  %v539_v52 = vmul.f32 %v533_v41, %v1529_v45 }
 0x192   : > { %v1705_v55 = vadd.f32 %v684_v54, %v652_v46  ;;  %v1707_v57 = vpop.permute.xlu0 %739  ;;  %v1709_v63 = vpop.permute.xlu1 %703  ;;  %v638_v46 = vld [vmem:[#allocation2 + $0x68] sm:$0xff]  ;;  %v565_v54 = vld [vmem:[#allocation2 + $0x20] sm:$0xff] }
 0x196   : > { %v1711_v0 = vpop.permute.xlu0 %731  ;;  %v1713_v5 = vpop.permute.xlu1 %695 }
 0x19a   : > { %v1715_v6 = vpop.permute.xlu0 %777  ;;  %v1717_v7 = vpop.permute.xlu1 %741 }
 0x19e   : > { %v1719_v8 = vpop.permute.xlu0 %769  ;;  %v1721_v11 = vpop.permute.xlu1 %733 }
 0x1a2   : > { %v1723_v12 = vpop.permute.xlu0 %815  ;;  %v1725_v13 = vpop.permute.xlu1 %779 }
 0x1a6   : > { %v545_v19 = vpop.permute.xlu0 %544  ;;  %v1727_v20 = vpop.permute.xlu1 %771 }
 0x1a7   : > { %v555_v22 = vsel %vm554_vm3, %v545_v19, %v1630_v61  ;;  %v557_v23 = vsel %vm554_vm3, %v1632_v62, %v545_v19 }
 0x1a8   : > { %v568_v27 = vmul.f32 %v562_v15, %v557_v23  ;;  %v569_v28 = vmul.f32 %v563_v16, %v555_v22 }
 0x1aa   : > { %v575_v32 = vadd.f32 %v569_v28, %v536_v26  ;;  %v584_v35 = vpop.permute.xlu0 %583  ;;  %v1737_v36 = vpop.permute.xlu1 %817  ;;  %v574_v62 = vadd.f32 %v568_v27, %v535_v31  ;;  %v676_v28 = vld [vmem:[#allocation2 + $0x98] sm:$0xff]  ;;  %v753_v31 = vld [vmem:[#allocation2 + $0x130] sm:$0xff] }
 0x1ab   : > { %v592_v61 = vsel %vm591_vm4, %v584_v35, %v1644_v9  ;;  %v594_v39 = vsel %vm591_vm4, %v1638_v1, %v584_v35 }
 0x1ac   : > { %v606_v42 = vmul.f32 %v600_v29, %v594_v39  ;;  %v607_v43 = vmul.f32 %v601_v30, %v592_v61  ;;  %v603_v29 = vld [vmem:[#allocation2 + $0x50] sm:$0xff]  ;;  %v715_v30 = vld [vmem:[#allocation2 + $0x100] sm:$0xff] }
 0x1ae   : > { %v612_v9 = vadd.f32 %v606_v42, %v574_v62  ;;  %v613_v15 = vadd.f32 %v607_v43, %v575_v32  ;;  %v622_v16 = vpop.permute.xlu0 %621  ;;  %v547_v19 = vpop.permute.xlu1 %546 }
 0x1af   : > { %v630_v1 = vsel %vm629_vm5, %v622_v16, %v1662_v24  ;;  %v632_v56 = vsel %vm629_vm5, %v1656_v17, %v622_v16  ;;  %v556_v45 = vsel %vm554_vm3, %v547_v19, %v1646_v10  ;;  %v558_v21 = vsel %vm554_vm3, %v1640_v4, %v547_v19  ;;  %v677_v10 = vld [vmem:[#allocation2 + $0xa0] sm:$0xff]  ;;  %v604_v4 = vld [vmem:[#allocation2 + $0x58] sm:$0xff] }
 0x1b0   : > { %v644_v22 = vmul.f32 %v638_v46, %v632_v56  ;;  %v645_v23 = vmul.f32 %v639_v49, %v630_v1  ;;  %v571_v26 = vmul.f32 %v565_v54, %v558_v21  ;;  %v572_v27 = vmul.f32 %v566_v14, %v556_v45  ;;  %v641_v16 = vld [vmem:[#allocation2 + $0x80] sm:$0xff]  ;;  %v642_v21 = vld [vmem:[#allocation2 + $0x88] sm:$0xff] }
 0x1b1   : > { %v710_v24 = vsel %vm705_vm7, %v1693_v47, %v1697_v50  ;;  %v748_v17 = vsel %vm743_vm8, %v1707_v57, %v1711_v0  ;;  %v791_v19 = vld [vmem:[#allocation2 + $0x160] sm:$0xff] }
 0x1b2   : > { %v650_v32 = vadd.f32 %v644_v22, %v612_v9  ;;  %v651_v35 = vadd.f32 %v645_v23, %v613_v15  ;;  %v577_v40 = vadd.f32 %v571_v26, %v538_v53  ;;  %v578_v41 = vadd.f32 %v572_v27, %v539_v52  ;;  %v660_v61 = vpop.permute.xlu0 %659  ;;  %v586_v39 = vpop.permute.xlu1 %585  ;;  %v714_v15 = vld [vmem:[#allocation2 + $0xf8] sm:$0xff] }
 0x1b3   : > { %v668_v62 = vsel %vm667_vm6, %v660_v61, %v1679_v37  ;;  %v670_v42 = vsel %vm667_vm6, %v1674_v33, %v660_v61  ;;  %v593_v43 = vsel %vm591_vm4, %v586_v39, %v1664_v25  ;;  %v595_v46 = vsel %vm591_vm4, %v1658_v18, %v586_v39  ;;  %v713_v33 = vld [vmem:[#allocation2 + $0xf0] sm:$0xff] }
 0x1b4   : > { %v682_v49 = vmul.f32 %v676_v28, %v670_v42  ;;  %v683_v53 = vmul.f32 %v677_v10, %v668_v62  ;;  %v609_v52 = vmul.f32 %v603_v29, %v595_v46  ;;  %v610_v54 = vmul.f32 %v604_v4, %v593_v43  ;;  %v679_v62 = vld [vmem:[#allocation2 + $0xb0] sm:$0xff] }
 0x1b5   : > { %v721_v14 = vmul.f32 %v715_v30, %v710_v24  ;;  %v759_v9 = vmul.f32 %v753_v31, %v748_v17  ;;  %v786_v37 = vsel %vm781_vm9, %v1715_v6, %v1719_v8  ;;  %v751_v30 = vld [vmem:[#allocation2 + $0x120] sm:$0xff]  ;;  %v680_v31 = vld [vmem:[#allocation2 + $0xb8] sm:$0xff] }
 0x1b6   : > { %v688_v25 = vadd.f32 %v682_v49, %v650_v32  ;;  %v689_v1 = vadd.f32 %v683_v53, %v651_v35  ;;  %v615_v56 = vadd.f32 %v609_v52, %v577_v40  ;;  %v616_v45 = vadd.f32 %v610_v54, %v578_v41  ;;  %v698_v18 = vpop.permute.xlu0 %697  ;;  %v624_v22 = vpop.permute.xlu1 %623  ;;  %v718_v32 = vld [vmem:[#allocation2 + $0x118] sm:$0xff]  ;;  %v756_v35 = vld [vmem:[#allocation2 + $0x148] sm:$0xff] }
 0x1b7   : > { %v706_v23 = vsel %vm705_vm7, %v698_v18, %v1693_v47  ;;  %v708_v26 = vsel %vm705_vm7, %v1697_v50, %v698_v18  ;;  %v631_v27 = vsel %vm629_vm5, %v624_v22, %v1681_v38  ;;  %v633_v28 = vsel %vm629_vm5, %v1676_v34, %v624_v22  ;;  %v752_v34 = vld [vmem:[#allocation2 + $0x128] sm:$0xff]  ;;  %v717_v18 = vld [vmem:[#allocation2 + $0x110] sm:$0xff] }
 0x1b8   : > { %v727_v24 = vadd.f32 %v721_v14, %v689_v1  ;;  %v719_v17 = vmul.f32 %v713_v33, %v708_v26  ;;  %v720_v10 = vmul.f32 %v714_v15, %v706_v23  ;;  %v647_v29 = vmul.f32 %v641_v16, %v633_v28  ;;  %v789_v16 = vld [vmem:[#allocation2 + $0x150] sm:$0xff] }
 0x1b9   : > { %v711_v47 = vsel %vm705_vm7, %v1709_v63, %v1713_v5  ;;  %v797_v50 = vmul.f32 %v791_v19, %v786_v37  ;;  %v749_v38 = vsel %vm743_vm8, %v1717_v7, %v1721_v11  ;;  %v648_v4 = vmul.f32 %v642_v21, %v631_v27 }
 0x1ba   : > { %v725_v40 = vadd.f32 %v719_v17, %v1691_v44  ;;  %v726_v41 = vadd.f32 %v720_v10, %v688_v25  ;;  %v653_v61 = vadd.f32 %v647_v29, %v615_v56  ;;  %v736_v39 = vpop.permute.xlu0 %735  ;;  %v662_v42 = vpop.permute.xlu1 %661  ;;  %v765_v43 = vadd.f32 %v759_v9, %v727_v24 }
 0x1bb   : > { %v654_v46 = vadd.f32 %v648_v4, %v616_v45  ;;  %v744_v49 = vsel %vm743_vm8, %v736_v39, %v1707_v57  ;;  %v746_v53 = vsel %vm743_vm8, %v1711_v0, %v736_v39  ;;  %v669_v52 = vsel %vm667_vm6, %v662_v42, %v1699_v51  ;;  %v790_v57 = vld [vmem:[#allocation2 + $0x158] sm:$0xff]  ;;  %v716_v45 = vld [vmem:[#allocation2 + $0x108] sm:$0xff] }
 0x1bc   : > { %v757_v44 = vmul.f32 %v751_v30, %v746_v53  ;;  %v758_v54 = vmul.f32 %v752_v34, %v744_v49  ;;  %v671_v14 = vsel %vm667_vm6, %v1695_v48, %v662_v42  ;;  %v686_v9 = vmul.f32 %v680_v31, %v669_v52  ;;  %v794_v48 = vld [vmem:[#allocation2 + $0x178] sm:$0xff]  ;;  %v792_v52 = vld [vmem:[#allocation2 + $0x168] sm:$0xff] }
 0x1bd   : > { %v724_v37 = vmul.f32 %v718_v32, %v711_v47  ;;  %v762_v33 = vmul.f32 %v756_v35, %v749_v38  ;;  %v685_v15 = vmul.f32 %v679_v62, %v671_v14  ;;  %v803_v19 = vadd.f32 %v797_v50, %v765_v43  ;;  %v828_v50 = vld [vmem:[#allocation2 + $0x188] sm:$0xff]  ;;  %v755_v38 = vld [vmem:[#allocation2 + $0x140] sm:$0xff] }
 0x1be   : > { %v787_v0 = vsel %vm781_vm9, %v1725_v13, %v1727_v20  ;;  %v763_v25 = vadd.f32 %v757_v44, %v725_v40  ;;  %v764_v51 = vadd.f32 %v758_v54, %v726_v41  ;;  %v692_v1 = vadd.f32 %v686_v9, %v654_v46  ;;  %v774_v56 = vpop.permute.xlu0 %773  ;;  %v700_v21 = vpop.permute.xlu1 %699  ;;  %v827_v43 = vld [vmem:[#allocation2 + $0x180] sm:$0xff]  ;;  %v829_v46 = vld [vmem:[#allocation2 + $0x190] sm:$0xff] }
 0x1bf   : > { %v691_v22 = vadd.f32 %v685_v15, %v653_v61  ;;  %v782_v23 = vsel %vm781_vm9, %v774_v56, %v1715_v6  ;;  %v784_v26 = vsel %vm781_vm9, %v1719_v8, %v774_v56  ;;  %v707_v27 = vsel %vm705_vm7, %v700_v21, %v1709_v63  ;;  %v754_v8 = vld [vmem:[#allocation2 + $0x138] sm:$0xff]  ;;  %v793_v44 = vld [vmem:[#allocation2 + $0x170] sm:$0xff] }
 0x1c0   : > { %v730_v28 = vadd.f32 %v724_v37, %v692_v1  ;;  %v795_v24 = vmul.f32 %v789_v16, %v784_v26  ;;  %v796_v17 = vmul.f32 %v790_v57, %v782_v23  ;;  %v709_v10 = vsel %vm705_vm7, %v1713_v5, %v700_v21  ;;  %v830_v21 = vld [vmem:[#allocation2 + $0x198] sm:$0xff] }
 0x1c1   : > { %v722_v29 = vmul.f32 %v716_v45, %v709_v10  ;;  %v723_v47 = vmul.f32 %v717_v18, %v707_v27  ;;  %v800_v6 = vmul.f32 %v794_v48, %v787_v0  ;;  %v831_v0 = vld [vmem:[#allocation2 + $0x1a0] sm:$0xff] }
 0x1c2   : > { %v801_v4 = vadd.f32 %v795_v24, %v763_v25  ;;  %v802_v30 = vadd.f32 %v796_v17, %v764_v51  ;;  %v812_v34 = vpop.permute.xlu0 %811  ;;  %v738_v31 = vpop.permute.xlu1 %737  ;;  %v768_v32 = vadd.f32 %v762_v33, %v730_v28 }
 0x1c3   : > { %v728_v63 = vadd.f32 %v722_v29, %v1705_v55  ;;  %v729_v35 = vadd.f32 %v723_v47, %v691_v22  ;;  %v820_v40 = vsel %vm819_vm10, %v812_v34, %v1723_v12  ;;  %v745_v5 = vsel %vm743_vm8, %v738_v31, %v1717_v7  ;;  %v832_v22 = vld [vmem:[#allocation2 + $0x1a8] sm:$0xff] }
 0x1c4   : > { %v834_v41 = vmul.f32 %v828_v50, %v820_v40  ;;  %v747_v61 = vsel %vm743_vm8, %v1721_v11, %v738_v31  ;;  %v761_v39 = vmul.f32 %v755_v38, %v745_v5  ;;  %v806_v62 = vadd.f32 %v800_v6, %v768_v32 }
 0x1c5   : > { %v760_v42 = vmul.f32 %v754_v8, %v747_v61 }
 0x1c6   : > { %v840_v55 = vadd.f32 %v834_v41, %v802_v30  ;;  %v767_v49 = vadd.f32 %v761_v39, %v729_v35  ;;  %v808_v53 = vpop.permute.xlu0 %807  ;;  %v776_v54 = vpop.permute.xlu1 %775  ;;  %v875_v41 = vld [vmem:[%s1934_s6] sm:$0xf] }
 0x1c7   : > { %v766_v14 = vadd.f32 %v760_v42, %v728_v63  ;;  %v822_v7 = vsel %vm819_vm10, %v808_v53, %v812_v34  ;;  %v824_v9 = vsel %vm819_vm10, %v1723_v12, %v808_v53  ;;  %v783_v11 = vsel %vm781_vm9, %v776_v54, %v1725_v13 }
 0x1c8   : > { %v833_v37 = vmul.f32 %v827_v43, %v822_v7  ;;  %v835_v33 = vmul.f32 %v829_v46, %v824_v9  ;;  %v785_v15 = vsel %vm781_vm9, %v1727_v20, %v776_v54  ;;  %v799_v57 = vmul.f32 %v793_v44, %v783_v11 }
 0x1c9   : > { %v798_v16 = vmul.f32 %v792_v52, %v785_v15  ;;  %v858_v13 = vadd.f32 %v1627_v60, %v840_v55  ;;  %v971_v46 = vunpack.c.h.bf16 %v1477_v2 }
 0x1ca   : > { %v839_v25 = vadd.f32 %v833_v37, %v801_v4  ;;  %v841_v51 = vadd.f32 %v835_v33, %v803_v19  ;;  %v814_v1 = vpop.permute.xlu1 %813  ;;  %v805_v45 = vadd.f32 %v799_v57, %v767_v49 }
 0x1cb   : > { %v804_v56 = vadd.f32 %v798_v16, %v766_v14  ;;  %v821_v12 = vsel %vm819_vm10, %v814_v1, %v1737_v36  ;;  %v864_v24 = vmax.f32 %v858_v13, 0.0 }
 0x1cc   : > { %v837_v18 = vmul.f32 %v831_v0, %v821_v12  ;;  %v857_v26 = vadd.f32 %v1627_v60, %v839_v25  ;;  %v859_v17 = vadd.f32 %v1627_v60, %v841_v51 }
 0x1cd   : > { %v870_v4 = vmin.f32 %v864_v24, 6.0 }
 0x1ce   : > { %v843_v48 = vadd.f32 %v837_v18, %v805_v45  ;;  %v810_v23 = vpop.permute.xlu1 %809  ;;  %v863_v38 = vmax.f32 %v857_v26, 0.0  ;;  %v865_v34 = vmax.f32 %v859_v17, 0.0 }
 0x1cf   : > { %v823_v20 = vsel %vm819_vm10, %v810_v23, %v814_v1  ;;  %v825_v19 = vsel %vm819_vm10, %v1737_v36, %v810_v23 }
 0x1d0   : > { %v861_v27 = vadd.f32 %v1625_v59, %v843_v48  ;;  %v836_v28 = vmul.f32 %v830_v21, %v823_v20  ;;  %v838_v10 = vmul.f32 %v832_v22, %v825_v19  ;;  %v869_v32 = vmin.f32 %v863_v38, 6.0 }
 0x1d1   : > { %v871_v60 = vmin.f32 %v865_v34, 6.0 }
 0x1d2   : > { %v842_v29 = vadd.f32 %v836_v28, %v804_v56  ;;  %v867_v47 = vmax.f32 %v861_v27, 0.0  ;;  %v844_v50 = vadd.f32 %v838_v10, %v806_v62  ;;  %v972_v62 = vunpack.c.l.bf16 %v1479_v3 }
 0x1d3   : > { %v883_v61 = vpop.permute.xlu0 %882 }
 0x1d4   : > { %v860_v6 = vadd.f32 %v1625_v59, %v842_v29  ;;  %v873_v30 = vmin.f32 %v867_v47, 6.0  ;;  %v862_v58 = vadd.f32 %v1625_v59, %v844_v50  ;;  %v970_v59 = vunpack.c.l.bf16 %v1477_v2 }
 0x1d6   : > { %v866_v36 = vmax.f32 %v860_v6, 0.0  ;;  %v877_v8 = vpack.c.bf16 %v873_v30, %v870_v4  ;;  %v868_v31 = vmax.f32 %v862_v58, 0.0 }
 0x1d8   : > { %v872_v63 = vmin.f32 %v866_v36, 6.0  ;;  %903 = vmatprep.subr.bf16.mxu0 %v877_v8  ;;  %v874_v35 = vmin.f32 %v868_v31, 6.0 }
 0x1da   : > { %v876_v40 = vpack.c.bf16 %v872_v63, %v869_v32  ;;  %v878_v5 = vpack.c.bf16 %v874_v35, %v871_v60 }
 0x1dc   : > { %904 = vmatpush1.bf16.msra.mxu0 %v876_v40  ;;  %1134 = vmatpush3.bf16.msra.mxu1 %v878_v5 }
 0x1df   : > { %1118 = vmatmul.mubr.msk.bf16.vlgmr.msra.gmra.mxu0 %vm885_vm11, %v875_v41  ;;  %1136 = vmatmul.mubr.msk.bf16.vlgmr.msra.gmra.mxu1 %vm885_vm11, %v875_v41 }
 0x29f   : > { %v923_v39 = vpop.f32.mrf.mxu0  ;;  %v964_v43 = vpop.f32.mrf.mxu1 }
 0x2a0   : > { %v924_v42 = vadd.f32 %v923_v39, %v883_v61  ;;  %v965_v55 = vadd.f32 %v964_v43, %v883_v61 }
 0x2a1   : > { %v925_v49 = vpop.f32.mrf.mxu0  ;;  %v1137_v44 = vpop.f32.mrf.mxu1 }
 0x2a2   : > { %v973_v53 = vadd.f32 %v970_v59, %v924_v42  ;;  %v926_v52 = vadd.f32 %v925_v49, %v883_v61  ;;  %v975_v54 = vadd.f32 %v972_v62, %v965_v55 }
 0x2a3   : > { %v927_v14 = vpop.f32.mrf.mxu0  ;;  %v967_v9 = vpop.f32.mrf.mxu1 }
 0x2a4   : > { %976 = vst [vmem:[%s350_s24] sm:$0xff] %v973_v53  ;;  %v974_v7 = vadd.f32 %v971_v46, %v926_v52  ;;  %978 = vst [vmem:[%s350_s24 + $0x10] sm:$0xff] %v975_v54 }
 0x2a5   : > { %v928_v2 = vpop.f32.mrf.mxu0  ;;  %v1138_v3 = vpop.f32.mrf.mxu1 }
 0x2a6   : > { %977 = vst [vmem:[%s350_s24 + $0x8] sm:$0xff] %v974_v7 }
 0x2a7   : > { %1266 = shalt.err (!%p1263_p3)
}
 0x2a8   : > { %s1267_s22 = scalar_lea.hbm %s1882_s12, 384  ;;  %s1271_s24 = scalar_lea.hbm %s1936_s8, 768 }
 0x2a9   : > { %p1268_p5 = scmp.ne.s32.totalorder %s1882_s12, %s1267_s22  ;;  %p1272_p9 = scmp.lt.s32.totalorder %s1882_s12, %s1936_s8 }
 0x2aa   : > { %p1273_p12 = scmp.lt.s32.totalorder %s1271_s24, %s1267_s22 }
 0x2ab   : > { %p1269_p6 = pnand %p1268_p5, %p1435_p4 }
 0x2ac   : > { %p1274_p10 = por %p1273_p12, %p1272_p9 }
 0x2ad   : > { %p1270_p7 = pneg %p1269_p6 }
 0x2af   : > { %p1275_p11 = pnand %p1274_p10, %p1270_p7 }
 0x2b1   : > { %1278 = shalt.err (!%p1275_p11)
}
 0x2b2   : > { %1146 = dma.vmem_to_hbm [thread:$0]  (%p1435_p4), %s1884_s25, 384, %s1882_s12, %s980_s30  }
 0x2b3 PF: > { %p1158_p13 = scmp.ge.s32.totalorder %s1333_s10, 2  ;;  %s1008_s14 = sand.u32 1, %s1313_s27  }
 0x2b4   : > { %s1009_s16 = scalar_lea.sflag [#allocation4], %s1008_s14 }
 0x2b5   : > { %p1153_p0 = pnand %p1158_p13, %p1442_p8 }
 0x2b7   : > { %p1154_p1 = pneg %p1153_p0 }
 0x2b9   : > { %1308 = dma.done.wait (%p1154_p1), %s1009_s16, 384  }
 0x2ba   : > { %1310 = vsyncadd (%p1154_p1), %s1009_s16, 4294966912  ;;  %s22_s10 = sadd.s32 1, %s1333_s10   ;;  %s1941_s27 = smov %s1317_s28 }
 0x2bb   : > { %p19_p2 = scmp.ge.s32.totalorder %s22_s10, 4   ;;  %s1942_s28 = smov %s1321_s29 }
 0x2bc   : > { %s1943_s29 = smov %s1448_s18  ;;  %s1944_s30 = smov %s1329_s9 }
 0x2bd   : > { %s1945_s9 = smov %s1947_s13  ;;  %21 = sbr.rel (!%p19_p2) target bundleno = 5 (0x5), region = 103 }
 0x2c2   :  { %1014 = vsyncpa [#allocation3], 1 }
 0x2c3   :  { %1016 = vsyncpa [#allocation3 + $0x1], 1 }
 0x2c4   :  { %1017 = vsyncpa [#allocation4], 1 }
 0x2c5   :  { %1019 = vsyncpa [#allocation4 + $0x1], 1 }

</bundles_post_ra>
